<compile_context>
chip_gen: v5e
topology: v5e:2x2
jax: 0.10.0
libtpu: 0.0.40
codegen_flags: <defaults>
</compile_context>

<pallas_src>
import jax
import jax.numpy as jnp
from jax.experimental import pallas as pl
from jax.experimental.pallas import tpu as pltpu

LANES = 128


def _make_kernel(S, H, A, out_w):
    """Kernel closed over the static sizes (state S, hidden H, action A)."""
    H4 = 4 * H
    pad_w = out_w - (A + 2 * H)

    def kernel(x_ref, h0_ref, c0_ref, wA_ref, wB_ref, bias_ref,
               out_ref, h_scr, c_scr):
        t = pl.program_id(0)

        # Seed the VMEM-resident recurrent carry on the first step only.
        @pl.when(t == 0)
        def _():
            h_scr[...] = h0_ref[...]
            c_scr[...] = c0_ref[...]

        state = x_ref[0]                       # (B, S)  f32
        h_prev = h_scr[...]                    # (B, H)  f32
        c_prev = c_scr[...]                    # (B, H)  f32
        bf16 = jnp.bfloat16

        # l1 + ReLU : (B, S) @ (S, 128)  -- bf16 weights, f32 accumulation.
        # (bias adds use an implicit (1,N) broadcast; negligible at this size)
        x = jnp.dot(state.astype(bf16), wA_ref[:S, :LANES],
                    preferred_element_type=jnp.float32)
        x = jnp.maximum(x + bias_ref[0:1, :LANES], 0.0)

        # l2 + ReLU : (B, 128) @ (128, H)
        x = jnp.dot(x.astype(bf16), wB_ref[:LANES, :H],
                    preferred_element_type=jnp.float32)
        x = jnp.maximum(x + bias_ref[2:3, :H], 0.0)

        # LSTM gates as two MXU pushes (no VMEM concat round-trip):
        #   gates = x @ W_ih^T + h @ W_hh^T + (b_ih + b_hh)
        gates = (jnp.dot(x.astype(bf16), wA_ref[S:S + H, :H4],
                         preferred_element_type=jnp.float32)
                 + jnp.dot(h_prev.astype(bf16), wA_ref[S + H:S + 2 * H, :H4],
                           preferred_element_type=jnp.float32)
                 + bias_ref[1:2, :H4])

        # Single full-tile sigmoid pass; g-gate rows were pre-scaled by 2 at
        # pack time so tanh(z) = 2*sigmoid(2z) - 1 needs no extra tanh pass.
        sg = jax.nn.sigmoid(gates)
        i_g = sg[:, 0 * H:1 * H]
        f_g = sg[:, 1 * H:2 * H]
        g_g = 2.0 * sg[:, 2 * H:3 * H] - 1.0
        o_g = sg[:, 3 * H:4 * H]

        c_new = f_g * c_prev + i_g * g_g
        h_new = o_g * jnp.tanh(c_new)

        # l3 (Q-values): (B, H) @ (H, A)
        q = jnp.dot(h_new.astype(bf16), wB_ref[LANES:LANES + H, :A],
                    preferred_element_type=jnp.float32)
        q = q + bias_ref[3:4, :A]

        # Carry the recurrent state to the next grid step.
        h_scr[...] = h_new
        c_scr[...] = c_new

        # One lane-padded output slab [q | h | c | 0] -> single full-tile store.
        parts = [q, h_new, c_new]
        if pad_w > 0:
            parts.append(jnp.zeros((q.shape[0], pad_w), jnp.float32))
        out_ref[0] = jnp.concatenate(parts, axis=1)

    return kernel


def pack_params(params, weight_dtype=jnp.bfloat16):
    """One-time parameter prep: transpose to (in, out), fuse the LSTM weights,
    pre-sum the LSTM biases, fold the g-gate tanh into the sigmoid pass (scale
    g rows/bias by 2), lane-pad, and store the weight slabs in bf16."""
    S = params["w1"].shape[1]
    H = params["w2"].shape[0]
    A = params["w3"].shape[0]
    H4 = 4 * H
    cols_a = max(LANES, H4)
    cols_b = LANES                                   # lane-pad wB to 128 wide

    # gates = [x | h] @ concat([W_ih, W_hh], axis=1).T
    w_lstm_t = jnp.concatenate([params["w_ih"], params["w_hh"]], axis=1).T  # (2H, 4H)
    b_lstm = params["b_ih"] + params["b_hh"]
    # tanh(z) = 2*sigmoid(2z) - 1  -> pre-scale the g gate by 2.
    gate_scale = jnp.ones((H4,), jnp.float32).at[2 * H:3 * H].set(2.0)
    w_lstm_t = w_lstm_t * gate_scale[None, :]
    b_lstm = b_lstm * gate_scale

    wA = jnp.zeros((S + 2 * H, cols_a), jnp.float32)      # [w1^T ; w_lstm^T]
    wA = wA.at[:S, :LANES].set(params["w1"].T)
    wA = wA.at[S:, :H4].set(w_lstm_t)

    wB = jnp.zeros((LANES + H, cols_b), jnp.float32)      # [w2^T ; w3^T]
    wB = wB.at[:LANES, :H].set(params["w2"].T)
    wB = wB.at[LANES:, :A].set(params["w3"].T)

    bias = jnp.zeros((4, cols_a), jnp.float32)
    bias = bias.at[0, :LANES].set(params["b1"])
    bias = bias.at[1, :H4].set(b_lstm)
    bias = bias.at[2, :H].set(params["b2"])
    bias = bias.at[3, :A].set(params["b3"])

    return {"wA": wA.astype(weight_dtype), "wB": wB.astype(weight_dtype),
            "bias": bias, "dims": (S, H, A)}


def critic_rollout(states, h0, c0, packed):
    """states: (T, B, S) f32; h0, c0: (B, H) f32.
    Returns (q_seq, h_seq, c_seq) = ((T,B,A), (T,B,H), (T,B,H))."""
    S, H, A = packed["dims"]
    T, B, _ = states.shape
    H4 = 4 * H
    out_w = max(LANES, ((A + 2 * H + LANES - 1) // LANES) * LANES)

    wA, wB, bias = packed["wA"], packed["wB"], packed["bias"]

    flops = 2 * T * B * (S * 128 + 128 * H + 2 * H * H4 + H * A)
    transc = T * B * (H4 + H)                        # sigmoid(4H) + tanh(H)
    bytes_accessed = (states.size * 4 + (h0.size + c0.size) * 4
                      + wA.size * wA.dtype.itemsize
                      + wB.size * wB.dtype.itemsize
                      + bias.size * 4 + T * B * out_w * 4)

    const = lambda t: (0, 0)
    out = pl.pallas_call(
        _make_kernel(S, H, A, out_w),
        out_shape=jax.ShapeDtypeStruct((T, B, out_w), jnp.float32),
        grid_spec=pltpu.PrefetchScalarGridSpec(
            num_scalar_prefetch=0,
            grid=(T,),
            in_specs=[
                pl.BlockSpec((1, B, S), lambda t: (t, 0, 0)),  # per-step state
                pl.BlockSpec((B, H), const),                   # h0 (t == 0 only)
                pl.BlockSpec((B, H), const),                   # c0 (t == 0 only)
                pl.BlockSpec(wA.shape, const),                 # resident weights
                pl.BlockSpec(wB.shape, const),
                pl.BlockSpec(bias.shape, const),
            ],
            out_specs=pl.BlockSpec((1, B, out_w), lambda t: (t, 0, 0)),
            scratch_shapes=[pltpu.VMEM((B, H), jnp.float32),   # h carry
                            pltpu.VMEM((B, H), jnp.float32)],  # c carry
        ),
        compiler_params=pltpu.CompilerParams(
            dimension_semantics=("arbitrary",)),               # sequential carry
        cost_estimate=pl.CostEstimate(flops=flops,
                                      transcendentals=transc,
                                      bytes_accessed=bytes_accessed),
    )(states, h0, c0, wA, wB, bias)

    q_seq = out[..., :A]
    h_seq = out[..., A:A + H]
    c_seq = out[..., A + H:A + 2 * H]
    return q_seq, h_seq, c_seq


def critic_forward(state, hidden_state, packed):
    """Single-step forward matching PyTorch Critic.forward semantics.
    state: (B, S); hidden_state: (h, c) each (B, H). Returns (q, (h_new, c_new))."""
    h0, c0 = hidden_state
    q_seq, h_seq, c_seq = critic_rollout(state[None], h0, c0, packed)
    return q_seq[0], (h_seq[0], c_seq[0])


def _reference_forward(state, hidden_state, params):
    """Pure-JAX f32 reference (mirrors the PyTorch module exactly)."""
    h0, c0 = hidden_state
    x = jnp.maximum(state @ params["w1"].T + params["b1"], 0.0)
    x = jnp.maximum(x @ params["w2"].T + params["b2"], 0.0)
    gates = (x @ params["w_ih"].T + params["b_ih"]
             + h0 @ params["w_hh"].T + params["b_hh"])
    H = h0.shape[1]
    i_g = jax.nn.sigmoid(gates[:, 0 * H:1 * H])
    f_g = jax.nn.sigmoid(gates[:, 1 * H:2 * H])
    g_g = jnp.tanh(gates[:, 2 * H:3 * H])
    o_g = jax.nn.sigmoid(gates[:, 3 * H:4 * H])
    c_new = f_g * c0 + i_g * g_g
    h_new = o_g * jnp.tanh(c_new)
    q = h_new @ params["w3"].T + params["b3"]
    return q, (h_new, c_new)


def _reference_rollout(states, h0, c0, params):
    def step(carry, s):
        q, carry = _reference_forward(s, carry, params)
        return carry, (q, carry[0], carry[1])
    _, (qs, hs, cs) = jax.lax.scan(step, (h0, c0), states)
    return qs, hs, cs


def make_params(key, state_space, action_space, hidden_space):
    ks = jax.random.split(key, 10)
    s = 0.1
    return {
        "w1": s * jax.random.normal(ks[0], (128, state_space), jnp.float32),
        "b1": s * jax.random.normal(ks[1], (128,), jnp.float32),
        "w2": s * jax.random.normal(ks[2], (hidden_space, 128), jnp.float32),
        "b2": s * jax.random.normal(ks[3], (hidden_space,), jnp.float32),
        "w_ih": s * jax.random.normal(ks[4], (4 * hidden_space, hidden_space), jnp.float32),
        "b_ih": s * jax.random.normal(ks[5], (4 * hidden_space,), jnp.float32),
        "w_hh": s * jax.random.normal(ks[6], (4 * hidden_space, hidden_space), jnp.float32),
        "b_hh": s * jax.random.normal(ks[7], (4 * hidden_space,), jnp.float32),
        "w3": s * jax.random.normal(ks[8], (action_space, hidden_space), jnp.float32),
        "b3": s * jax.random.normal(ks[9], (action_space,), jnp.float32),
    }


if __name__ == "__main__":
    STATE, ACTION, HIDDEN, BATCH, T = 32, 8, 32, 8, 6

    key = jax.random.PRNGKey(0)
    kp, ks, kh, kc = jax.random.split(key, 4)
    params = make_params(kp, STATE, ACTION, HIDDEN)
    packed = pack_params(params)          # one-time transpose / fuse / bf16 pack

    states = jax.random.normal(ks, (T, BATCH, STATE), jnp.float32)
    h0 = jax.random.normal(kh, (BATCH, HIDDEN), jnp.float32)
    c0 = jax.random.normal(kc, (BATCH, HIDDEN), jnp.float32)

    # Multi-step rollout: weights resident in VMEM, h/c carried in scratch.
    q_seq, h_seq, c_seq = critic_rollout(states, h0, c0, packed)
    q_seq = jax.block_until_ready(q_seq)

    q_ref, h_ref, c_ref = _reference_rollout(states, h0, c0, params)
    assert q_seq.shape == (T, BATCH, ACTION)
    # bf16 weight slabs -> slightly looser tolerance than the pure-f32 version.
    assert jnp.allclose(q_seq, q_ref, atol=5e-2, rtol=5e-2), "rollout q mismatch"
    assert jnp.allclose(h_seq, h_ref, atol=5e-2, rtol=5e-2), "rollout h mismatch"
    assert jnp.allclose(c_seq, c_ref, atol=5e-2, rtol=5e-2), "rollout c mismatch"

    # Single-step forward (PyTorch Critic.forward semantics, T = 1 case).
    q1, (h1, c1) = critic_forward(states[0], (h0, c0), packed)
    q1 = jax.block_until_ready(q1)
    q1_ref, (h1_ref, c1_ref) = _reference_forward(states[0], (h0, c0), params)
    assert q1.shape == (BATCH, ACTION)
    assert jnp.allclose(q1, q1_ref, atol=5e-2, rtol=5e-2), "step q mismatch"
    assert jnp.allclose(h1, h1_ref, atol=5e-2, rtol=5e-2), "step h mismatch"
    assert jnp.allclose(c1, c1_ref, atol=5e-2, rtol=5e-2), "step c mismatch"

    print("KERNEL_OK")
</pallas_src>

<mosaic_0001>
module attributes {stable_mosaic.version = 11 : i64} {
  func.func @kernel(%arg0: i32, %arg1: memref<1x8x32xf32, #tpu.memory_space<vmem>>, %arg2: memref<8x32xf32, #tpu.memory_space<vmem>>, %arg3: memref<8x32xf32, #tpu.memory_space<vmem>>, %arg4: memref<96x128xbf16, #tpu.memory_space<vmem>>, %arg5: memref<160x128xbf16, #tpu.memory_space<vmem>>, %arg6: memref<4x128xf32, #tpu.memory_space<vmem>>, %arg7: memref<1x8x128xf32, #tpu.memory_space<vmem>>, %arg8: memref<8x32xf32, #tpu.memory_space<vmem>>, %arg9: memref<8x32xf32, #tpu.memory_space<vmem>>) attributes {dimension_semantics = [#tpu.dimension_semantics<arbitrary>], iteration_bounds = array<i64: 6>, scalar_prefetch = 0 : i64, scratch_operands = 2 : i64, tpu.core_type = #tpu.core_type<tc>, window_params = [{transform_indices = @transform_0, window_bounds = array<i64: 1, 8, 32>}, {pipeline_mode = #tpu.pipeline_mode<synchronous>, transform_indices = @transform_1, window_bounds = array<i64: 8, 32>}, {pipeline_mode = #tpu.pipeline_mode<synchronous>, transform_indices = @transform_2, window_bounds = array<i64: 8, 32>}, {pipeline_mode = #tpu.pipeline_mode<synchronous>, transform_indices = @transform_3, window_bounds = array<i64: 96, 128>}, {pipeline_mode = #tpu.pipeline_mode<synchronous>, transform_indices = @transform_4, window_bounds = array<i64: 160, 128>}, {pipeline_mode = #tpu.pipeline_mode<synchronous>, transform_indices = @transform_5, window_bounds = array<i64: 4, 128>}, {transform_indices = @transform_6, window_bounds = array<i64: 1, 8, 128>}]} {
    %c0_i32 = arith.constant 0 : i32
    %0 = arith.cmpi eq, %arg0, %c0_i32 : i32
    %1 = arith.extui %0 : i1 to i32
    %c0_i32_0 = arith.constant 0 : i32
    %2 = arith.cmpi ne, %1, %c0_i32_0 : i32
    scf.if %2 {
      %c0_36 = arith.constant 0 : index
      %c0_37 = arith.constant 0 : index
      %64 = vector.load %arg2[%c0_36, %c0_37] : memref<8x32xf32, #tpu.memory_space<vmem>>, vector<8x32xf32>
      %c0_38 = arith.constant 0 : index
      %c0_39 = arith.constant 0 : index
      %65 = vector.load %arg8[%c0_38, %c0_39] : memref<8x32xf32, #tpu.memory_space<vmem>>, vector<8x32xf32>
      tpu.vector_store %arg8[%c0_38, %c0_39], %64 {strides = array<i32>} : memref<8x32xf32, #tpu.memory_space<vmem>>, vector<8x32xf32>,
      %c0_40 = arith.constant 0 : index
      %c0_41 = arith.constant 0 : index
      %66 = vector.load %arg3[%c0_40, %c0_41] : memref<8x32xf32, #tpu.memory_space<vmem>>, vector<8x32xf32>
      %c0_42 = arith.constant 0 : index
      %c0_43 = arith.constant 0 : index
      %67 = vector.load %arg9[%c0_42, %c0_43] : memref<8x32xf32, #tpu.memory_space<vmem>>, vector<8x32xf32>
      tpu.vector_store %arg9[%c0_42, %c0_43], %66 {strides = array<i32>} : memref<8x32xf32, #tpu.memory_space<vmem>>, vector<8x32xf32>,
    } else {
    }
    %c0 = arith.constant 0 : index
    %c0_1 = arith.constant 0 : index
    %c0_2 = arith.constant 0 : index
    %3 = vector.load %arg1[%c0, %c0_1, %c0_2] : memref<1x8x32xf32, #tpu.memory_space<vmem>>, vector<1x8x32xf32>
    %4 = vector.shape_cast %3 : vector<1x8x32xf32> to vector<8x32xf32>
    %c0_3 = arith.constant 0 : index
    %c0_4 = arith.constant 0 : index
    %5 = vector.load %arg8[%c0_3, %c0_4] : memref<8x32xf32, #tpu.memory_space<vmem>>, vector<8x32xf32>
    %c0_5 = arith.constant 0 : index
    %c0_6 = arith.constant 0 : index
    %6 = vector.load %arg9[%c0_5, %c0_6] : memref<8x32xf32, #tpu.memory_space<vmem>>, vector<8x32xf32>
    %7 = arith.truncf %4 : vector<8x32xf32> to vector<8x32xbf16>
    %c0_7 = arith.constant 0 : index
    %c0_8 = arith.constant 0 : index
    %8 = vector.load %arg4[%c0_7, %c0_8] : memref<96x128xbf16, #tpu.memory_space<vmem>>, vector<32x128xbf16>
    %cst = arith.constant dense<0.000000e+00> : vector<8x128xf32>
    %9 = tpu.matmul %7, %8, %cst {dimension_numbers = #tpu.dot_dimension_numbers<[1], [0], [0], [1], [0, 0, 1, 1], [], []>} : vector<8x32xbf16>, vector<32x128xbf16>, vector<8x128xf32> -> vector<8x128xf32>
    %c0_9 = arith.constant 0 : index
    %c0_10 = arith.constant 0 : index
    %10 = vector.load %arg6[%c0_9, %c0_10] : memref<4x128xf32, #tpu.memory_space<vmem>>, vector<1x128xf32>
    %11 = vector.broadcast %10 : vector<1x128xf32> to vector<8x128xf32>
    %12 = arith.addf %9, %11 : vector<8x128xf32>
    %cst_11 = arith.constant 0.000000e+00 : f32
    %13 = vector.broadcast %cst_11 : f32 to vector<8x128xf32>
    %14 = arith.maximumf %12, %13 : vector<8x128xf32>
    %15 = arith.truncf %14 : vector<8x128xf32> to vector<8x128xbf16>
    %c0_12 = arith.constant 0 : index
    %c0_13 = arith.constant 0 : index
    %16 = vector.load %arg5[%c0_12, %c0_13] : memref<160x128xbf16, #tpu.memory_space<vmem>>, vector<128x32xbf16>
    %cst_14 = arith.constant dense<0.000000e+00> : vector<8x32xf32>
    %17 = tpu.matmul %15, %16, %cst_14 {dimension_numbers = #tpu.dot_dimension_numbers<[1], [0], [0], [1], [0, 0, 1, 1], [], []>} : vector<8x128xbf16>, vector<128x32xbf16>, vector<8x32xf32> -> vector<8x32xf32>
    %c2 = arith.constant 2 : index
    %c0_15 = arith.constant 0 : index
    %18 = vector.load %arg6[%c2, %c0_15] : memref<4x128xf32, #tpu.memory_space<vmem>>, vector<1x32xf32>
    %19 = vector.broadcast %18 : vector<1x32xf32> to vector<8x32xf32>
    %20 = arith.addf %17, %19 : vector<8x32xf32>
    %cst_16 = arith.constant 0.000000e+00 : f32
    %21 = vector.broadcast %cst_16 : f32 to vector<8x32xf32>
    %22 = arith.maximumf %20, %21 : vector<8x32xf32>
    %23 = arith.truncf %22 : vector<8x32xf32> to vector<8x32xbf16>
    %c32 = arith.constant 32 : index
    %c0_17 = arith.constant 0 : index
    %24 = vector.load %arg4[%c32, %c0_17] : memref<96x128xbf16, #tpu.memory_space<vmem>>, vector<32x128xbf16>
    %cst_18 = arith.constant dense<0.000000e+00> : vector<8x128xf32>
    %25 = tpu.matmul %23, %24, %cst_18 {dimension_numbers = #tpu.dot_dimension_numbers<[1], [0], [0], [1], [0, 0, 1, 1], [], []>} : vector<8x32xbf16>, vector<32x128xbf16>, vector<8x128xf32> -> vector<8x128xf32>
    %26 = arith.truncf %5 : vector<8x32xf32> to vector<8x32xbf16>
    %c64 = arith.constant 64 : index
    %c0_19 = arith.constant 0 : index
    %27 = vector.load %arg4[%c64, %c0_19] : memref<96x128xbf16, #tpu.memory_space<vmem>>, vector<32x128xbf16>
    %cst_20 = arith.constant dense<0.000000e+00> : vector<8x128xf32>
    %28 = tpu.matmul %26, %27, %cst_20 {dimension_numbers = #tpu.dot_dimension_numbers<[1], [0], [0], [1], [0, 0, 1, 1], [], []>} : vector<8x32xbf16>, vector<32x128xbf16>, vector<8x128xf32> -> vector<8x128xf32>
    %29 = arith.addf %25, %28 : vector<8x128xf32>
    %c1 = arith.constant 1 : index
    %c0_21 = arith.constant 0 : index
    %30 = vector.load %arg6[%c1, %c0_21] : memref<4x128xf32, #tpu.memory_space<vmem>>, vector<1x128xf32>
    %31 = vector.broadcast %30 : vector<1x128xf32> to vector<8x128xf32>
    %32 = arith.addf %29, %31 : vector<8x128xf32>
    %33 = arith.negf %32 : vector<8x128xf32>
    %34 = math.exp %33 : vector<8x128xf32>
    %cst_22 = arith.constant 1.000000e+00 : f32
    %35 = vector.broadcast %cst_22 : f32 to vector<8x128xf32>
    %36 = arith.addf %35, %34 : vector<8x128xf32>
    %37 = arith.divf %35, %36 : vector<8x128xf32>
    %38 = vector.extract_strided_slice %37 {offsets = [0, 0], sizes = [8, 32], strides = [1, 1]} : vector<8x128xf32> to vector<8x32xf32>
    %39 = vector.extract_strided_slice %37 {offsets = [0, 32], sizes = [8, 32], strides = [1, 1]} : vector<8x128xf32> to vector<8x32xf32>
    %40 = vector.extract_strided_slice %37 {offsets = [0, 64], sizes = [8, 32], strides = [1, 1]} : vector<8x128xf32> to vector<8x32xf32>
    %cst_23 = arith.constant 2.000000e+00 : f32
    %41 = vector.broadcast %cst_23 : f32 to vector<8x32xf32>
    %42 = arith.mulf %41, %40 : vector<8x32xf32>
    %cst_24 = arith.constant 1.000000e+00 : f32
    %43 = vector.broadcast %cst_24 : f32 to vector<8x32xf32>
    %44 = arith.subf %42, %43 : vector<8x32xf32>
    %45 = vector.extract_strided_slice %37 {offsets = [0, 96], sizes = [8, 32], strides = [1, 1]} : vector<8x128xf32> to vector<8x32xf32>
    %46 = arith.mulf %39, %6 : vector<8x32xf32>
    %47 = arith.mulf %38, %44 : vector<8x32xf32>
    %48 = arith.addf %46, %47 : vector<8x32xf32>
    %49 = math.tanh %48 : vector<8x32xf32>
    %50 = arith.mulf %45, %49 : vector<8x32xf32>
    %51 = arith.truncf %50 : vector<8x32xf32> to vector<8x32xbf16>
    %c128 = arith.constant 128 : index
    %c0_25 = arith.constant 0 : index
    %52 = vector.load %arg5[%c128, %c0_25] : memref<160x128xbf16, #tpu.memory_space<vmem>>, vector<32x8xbf16>
    %cst_26 = arith.constant dense<0.000000e+00> : vector<8x8xf32>
    %53 = tpu.matmul %51, %52, %cst_26 {dimension_numbers = #tpu.dot_dimension_numbers<[1], [0], [0], [1], [0, 0, 1, 1], [], []>} : vector<8x32xbf16>, vector<32x8xbf16>, vector<8x8xf32> -> vector<8x8xf32>
    %c3 = arith.constant 3 : index
    %c0_27 = arith.constant 0 : index
    %54 = vector.load %arg6[%c3, %c0_27] : memref<4x128xf32, #tpu.memory_space<vmem>>, vector<1x8xf32>
    %55 = vector.broadcast %54 : vector<1x8xf32> to vector<8x8xf32>
    %56 = arith.addf %53, %55 : vector<8x8xf32>
    %c0_28 = arith.constant 0 : index
    %c0_29 = arith.constant 0 : index
    %57 = vector.load %arg8[%c0_28, %c0_29] : memref<8x32xf32, #tpu.memory_space<vmem>>, vector<8x32xf32>
    tpu.vector_store %arg8[%c0_28, %c0_29], %50 {strides = array<i32>} : memref<8x32xf32, #tpu.memory_space<vmem>>, vector<8x32xf32>,
    %c0_30 = arith.constant 0 : index
    %c0_31 = arith.constant 0 : index
    %58 = vector.load %arg9[%c0_30, %c0_31] : memref<8x32xf32, #tpu.memory_space<vmem>>, vector<8x32xf32>
    tpu.vector_store %arg9[%c0_30, %c0_31], %48 {strides = array<i32>} : memref<8x32xf32, #tpu.memory_space<vmem>>, vector<8x32xf32>,
    %cst_32 = arith.constant 0.000000e+00 : f32
    %59 = vector.broadcast %cst_32 : f32 to vector<8x56xf32>
    %60 = tpu.concatenate %56, %50, %48, %59 in 1 : vector<8x8xf32>, vector<8x32xf32>, vector<8x32xf32>, vector<8x56xf32> -> vector<8x128xf32>
    %c0_33 = arith.constant 0 : index
    %c0_34 = arith.constant 0 : index
    %c0_35 = arith.constant 0 : index
    %61 = vector.load %arg7[%c0_33, %c0_34, %c0_35] : memref<1x8x128xf32, #tpu.memory_space<vmem>>, vector<1x8x128xf32>
    %62 = vector.shape_cast %61 : vector<1x8x128xf32> to vector<8x128xf32>
    %63 = vector.shape_cast %60 : vector<8x128xf32> to vector<1x8x128xf32>
    tpu.vector_store %arg7[%c0_33, %c0_34, %c0_35], %63 {strides = array<i32>} : memref<1x8x128xf32, #tpu.memory_space<vmem>>, vector<1x8x128xf32>,
    return
  }
  func.func @transform_0(%arg0: i32) -> (i32, i32, i32) {
    %c0_i32 = arith.constant 0 : i32
    %c0_i32_0 = arith.constant 0 : i32
    %c0_i32_1 = arith.constant 0 : i32
    return %arg0, %c0_i32, %c0_i32_0 : i32, i32, i32
  }
  func.func @transform_1(%arg0: i32) -> (i32, i32) {
    %c0_i32 = arith.constant 0 : i32
    %c0_i32_0 = arith.constant 0 : i32
    %c0_i32_1 = arith.constant 0 : i32
    return %c0_i32, %c0_i32_0 : i32, i32
  }
  func.func @transform_2(%arg0: i32) -> (i32, i32) {
    %c0_i32 = arith.constant 0 : i32
    %c0_i32_0 = arith.constant 0 : i32
    %c0_i32_1 = arith.constant 0 : i32
    return %c0_i32, %c0_i32_0 : i32, i32
  }
  func.func @transform_3(%arg0: i32) -> (i32, i32) {
    %c0_i32 = arith.constant 0 : i32
    %c0_i32_0 = arith.constant 0 : i32
    %c0_i32_1 = arith.constant 0 : i32
    return %c0_i32, %c0_i32_0 : i32, i32
  }
  func.func @transform_4(%arg0: i32) -> (i32, i32) {
    %c0_i32 = arith.constant 0 : i32
    %c0_i32_0 = arith.constant 0 : i32
    %c0_i32_1 = arith.constant 0 : i32
    return %c0_i32, %c0_i32_0 : i32, i32
  }
  func.func @transform_5(%arg0: i32) -> (i32, i32) {
    %c0_i32 = arith.constant 0 : i32
    %c0_i32_0 = arith.constant 0 : i32
    %c0_i32_1 = arith.constant 0 : i32
    return %c0_i32, %c0_i32_0 : i32, i32
  }
  func.func @transform_6(%arg0: i32) -> (i32, i32, i32) {
    %c0_i32 = arith.constant 0 : i32
    %c0_i32_0 = arith.constant 0 : i32
    %c0_i32_1 = arith.constant 0 : i32
    return %arg0, %c0_i32, %c0_i32_0 : i32, i32, i32
  }
}

</mosaic_0001>

<bundles_post_ra>
// kernel: tpu_custom_call.1
= control target key start
LH: loop header
LB: loop body
LE: loop exit
PB: predicated region body
PF: predicated region fallthrough
CT: control target
= control target key end

     0   :  { %s1431_s0 = inlined_call_operand.hbm [shape: f32[6,8,32], index: 0, kind: input, shape index: {}]   ;;  %s1432_s1 = inlined_call_operand.hbm [shape: f32[8,32], index: 1, kind: input, shape index: {}]   ;;  %s1433_s2 = inlined_call_operand.hbm [shape: f32[8,32], index: 2, kind: input, shape index: {}]   ;;  %s1434_s3 = inlined_call_operand.hbm [shape: bf16[96,128], index: 3, kind: input, shape index: {}]   ;;  %s1435_s4 = inlined_call_operand.hbm [shape: bf16[160,128], index: 4, kind: input, shape index: {}]   ;;  %s1436_s5 = inlined_call_operand.vmem [shape: f32[4,128], index: 5, kind: input, shape index: {}]   ;;  %s1437_s6 = inlined_call_operand.hbm [shape: f32[6,8,128], index: 6, kind: output, shape index: {}]  }
   0x1   :  { %1438 = sst [smem:[#allocation18_spill]] %s1432_s1 }
   0x2   :  { %11 = vsyncpa [#allocation5], 0 }
   0x3   :  { %13 = vsyncpa [#allocation5 + $0x1], 0 }
   0x4   :  { %14 = vsyncpa [#allocation8], 0 }
   0x5   :  { %15 = vsyncpa [#allocation11], 0 }
   0x6   :  { %16 = vsyncpa [#allocation6], 0 }
   0x7   :  { %18 = vsyncpa [#allocation6 + $0x1], 0  ;;  %s1241_s21 = smov 0   ;;  %s1243_s22 = smov 0  }
   0x8   :  { %s1245_s23 = smov 0   ;;  %s1247_s24 = smov 0  }
   0x9 LB: > { %s1439_s1 = sld [smem:[#allocation18_spill]]  ;;  %s1265_s28 = sadd.s32 4294967295, %s1193_s24   ;;  %s1193_s24 = sphi %s1247_s24, %s1451_s24   ;;  %s1189_s23 = sphi %s1245_s23, %s1450_s23   ;;  %s1185_s22 = sphi %s1243_s22, %s1449_s22   ;;  %s1181_s21 = sphi %s1241_s21, %s1448_s21  }
   0xa   : > { %p759_p0 = scmp.ge.s32.totalorder %s1193_s24, 1  ;;  %p45_p1 = scmp.eq.s32.totalorder %s1265_s28, 0 }
   0xb   : > { %p186_p2 = scmp.lt.s32.totalorder %s1193_s24, 7  ;;  %s1195_s30 = smov [#allocation7]  }
   0xc   : > { %s200_s7 = sshll.u32 %s1195_s30, 4  ;;  %s221_s10 = sshll.u32 %s1434_s3, 4  ;;  %s201_s7 = int_to_ptr.vmem [resolvable:$true] %s200_s7  ;;  %s222_s10 = int_to_ptr.hbm [resolvable:$true] %s221_s10 }
   0xd   : > { %p1271_p4 = pnand %p759_p0, %p186_p2  ;;  %s1196_s12 = smov [#allocation10]  }
   0xe   : > { %s223_s13 = sshll.u32 %s1196_s12, 4  ;;  %s1197_s14 = smov 64   ;;  %s224_s13 = int_to_ptr.vmem [resolvable:$true] %s223_s13 }
   0xf   : > { %s198_s27 = sshll.u32 %s1439_s1, 4  ;;  %p885_p5 = pneg %p1271_p4  ;;  %s199_s27 = int_to_ptr.hbm [resolvable:$true] %s198_s27 }
  0x10   : > { %s1198_s15 = smov 4   ;;  %s210_s18 = sshll.u32 %s1433_s2, 4  ;;  %s211_s18 = int_to_ptr.hbm [resolvable:$true] %s210_s18 }
  0x11   : > { %p1282_p6 = pnand %p885_p5, %p45_p1  ;;  %s1199_s19 = smov [#allocation9]  }
  0x12   : > { %s212_s20 = sshll.u32 %s1199_s19, 4  ;;  %s1200_s30 = smov [#allocation12]   ;;  %s213_s20 = int_to_ptr.vmem [resolvable:$true] %s212_s20 }
  0x13   : > { %888 = dma.hbm_to_vmem [thread:$0]  (!%p1282_p6), %s199_s27, 128, %s201_s7, [#allocation8]  }
  0x14   : > { %894 = dma.hbm_to_vmem [thread:$0]  (!%p1282_p6), %s222_s10, 768, %s224_s13, [#allocation11], %s1197_s14, %s1197_s14, %s1198_s15  }
  0x15   : > { %s235_s27 = sshll.u32 %s1435_s4, 4  ;;  %s237_s7 = sshll.u32 %s1200_s30, 4  ;;  %s236_s27 = int_to_ptr.hbm [resolvable:$true] %s235_s27  ;;  %s238_s7 = int_to_ptr.vmem [resolvable:$true] %s237_s7 }
  0x16   : > { %891 = dma.hbm_to_vmem [thread:$0]  (!%p1282_p6), %s211_s18, 128, %s213_s20, [#allocation8]  }
  0x17   : > { %897 = dma.hbm_to_vmem [thread:$0]  (!%p1282_p6), %s236_s27, 1280, %s238_s7, [#allocation11], %s1197_s14, %s1197_s14, %s1198_s15  }
  0x18   : > { %s758_s8 = sadd.s32 4294967294, %s1193_s24   ;;  %s1302_s9 = sadd.s32 1, %s1193_s24  }
  0x19   : > { %s28_s10 = ssub.s32 %s1193_s24, %s1302_s9  ;;  %s31_s12 = sadd.s32 1, %s1189_s23 }
  0x1a   : > { %p29_p7 = scmp.eq.s32.totalorder %s28_s10, 0  ;;  %p38_p8 = scmp.ne.s32.totalorder %s1189_s23, %s1185_s22 }
  0x1b   : > { %p39_p9 = scmp.eq.s32.totalorder %s1193_s24, 0  ;;  %p44_p10 = scmp.ne.s32.totalorder %s1185_s22, %s1181_s21 }
  0x1c   : > { %s1313_s13 = scalar_select %p29_p7, %s1189_s23, %s31_s12  }
  0x1d   : > { %p1315_p11 = por %p39_p9, %p38_p8  ;;  %p1321_p12 = por %p45_p1, %p44_p10 }
  0x1e   : > { %p173_p13 = scmp.eq.s32.totalorder %s1265_s28, 5  ;;  %p179_p0 = scmp.eq.s32.totalorder %s758_s8, 5 }
  0x1f   : > { %p910_p2 = scmp.lt.s32.totalorder %s1193_s24, 6  ;;  %s254_s14 = sand.u32 1, %s1189_s23  }
  0x20   : > { %p1328_p5 = por %p173_p13, %p38_p8  ;;  %p1332_p6 = por %p179_p0, %p44_p10 }
  0x21   : > { %s765_s18 = sshll.u32 %s254_s14, 3  ;;  %s766_s19 = sshll.u32 %s1193_s24, 3 }
  0x22   : > { %s262_s26 = scalar_lea.hbm %s1431_s0, %s766_s19  ;;  %s258_s27 = scalar_lea.vmem [#allocation4], %s765_s18 }
  0x23   : > { %s266_s30 = sshll.u32 %s258_s27, 4  ;;  %s264_s7 = sshll.u32 %s262_s26, 4  ;;  %s267_s30 = int_to_ptr.vmem [resolvable:$true] %s266_s30  ;;  %s265_s7 = int_to_ptr.hbm [resolvable:$true] %s264_s7 }
  0x24   : > { %p1342_p7 = pnand %p910_p2, %p1315_p11  ;;  %s255_s10 = scalar_lea.sflag [#allocation5], %s254_s14 }
  0x25   : > { %s1089_s12 = sshra.s32 %s265_s7, 4  ;;  %s1096_s20 = scalar_lea.hbm %s1431_s0, 48  ;;  %s1090_s12 = int_to_ptr.hbm [resolvable:$true] %s1089_s12 }
  0x26   : > { %s1091_s1 = scalar_lea.hbm %s1090_s12, 8  ;;  %p1093_p9 = pneg %p1342_p7 }
  0x27   : > { %p1092_p8 = scmp.ne.s32.totalorder %s1090_s12, %s1091_s1  ;;  %p1097_p11 = scmp.lt.s32.totalorder %s1090_s12, %s1431_s0 }
  0x28   : > { %p1098_p0 = scmp.lt.s32.totalorder %s1096_s20, %s1091_s1 }
  0x29   : > { %p1094_p10 = pnand %p1093_p9, %p1092_p8 }
  0x2a   : > { %p1099_p2 = por %p1098_p0, %p1097_p11 }
  0x2b   : > { %p1095_p13 = pneg %p1094_p10 }
  0x2d   : > { %p1100_p3 = pnand %p1099_p2, %p1095_p13 }
  0x2f   : > { %1103 = shalt.err (!%p1100_p3)
}
  0x30   : > { %901 = dma.hbm_to_vmem [thread:$0]  (!%p1342_p7), %s265_s7, 128, %s267_s30, %s255_s10  }
  0x31   : > { %275 = sbr.rel (%p1271_p4) target bundleno = 1094 (0x446), region = 44  ;;  %s1359_s14 = sand.u32 (!%p1271_p4), 1, %s1185_s22  }
  0x32   : > { %s768_s26 = sshll.u32 (!%p1271_p4), %s1359_s14, 3  ;;  %s278_s27 = scalar_lea.sflag (!%p1271_p4), [#allocation5], %s1359_s14 }
  0x33   : > { %s281_s18 = scalar_lea.vmem (!%p1271_p4), [#allocation4], %s768_s26 }
  0x36   : > { %1164 = dma.done.wait (%p1321_p12), %s278_s27, 128  }
  0x37   : > { %1166 = vsyncadd (%p1321_p12), %s278_s27, 4294967168 }
  0x38   : > { %1168 = dma.done.wait (%p45_p1), [#allocation8], 256  }
  0x39   : > { %1170 = vsyncadd (%p45_p1), [#allocation8], 4294967040 }
  0x3a   : > { %1172 = dma.done.wait (%p45_p1), [#allocation11], 2048  }
  0x3b   : > { %1174 = vsyncadd (%p45_p1), [#allocation11], 4294965248  ;;  %s1375_s1 = scalar_lea.vmem [#allocation13], %s768_s26  ;;  %p1447_p3 = scmp.ne.s32.totalorder %s1265_s28, 0 }
  0x3d   : > { %335 = sbr.rel (%p1447_p3) target bundleno = 69 (0x45), region = 68 }
  0x42   : > { %v336_v0 = vld [vmem:[#allocation7] sm:$0xff]  ;;  %vm337_vm0 = vcmask 261120   ;;  %v339_v1 = vld [vmem:[#allocation9] sm:$0xff] }
  0x43   : > { %338 = vst.msk [vmem:[#allocation2] sm:$0xff] %vm337_vm0, %v336_v0 }
  0x44   : > { %340 = vst.msk [vmem:[#allocation3] sm:$0xff] %vm337_vm0, %v339_v1 }
  0x45 PF: > { %v850_v2 = vld [vmem:[#allocation10 + $0x8] sm:$0xff]  ;;  %v849_v4 = vld [vmem:[#allocation10] sm:$0xff]  ;;  %vm363_vm1 = vcmask 261120   ;;  %v856_v8 = vld [vmem:[#allocation12 + $0x28] sm:$0xff]  ;;  %s1201_s12 = smov 64   ;;  %s1202_s19 = smov 32  }
  0x46   : > { %v858_v3 = vld [vmem:[#allocation12 + $0x38] sm:$0xff]  ;;  %373 = vmatpush.bf16.msra.mxu0 %v850_v2  ;;  %v857_v6 = vld [vmem:[#allocation12 + $0x30] sm:$0xff]  ;;  %v855_v9 = vld [vmem:[#allocation12 + $0x20] sm:$0xff]  ;;  %s1203_s20 = smov 8   ;;  %s1204_s25 = smov 40   ;;  %vm627_vm6 = vcmask 64512  }
  0x47   : > { %v341_v5 = vld [vmem:[%s281_s18] sm:$0xff]  ;;  %448 = vmatpush.bf16.msra.mxu1 %v858_v3  ;;  %v852_v12 = vld [vmem:[#allocation12 + $0x8] sm:$0xff]  ;;  %v851_v13 = vld [vmem:[#allocation12] sm:$0xff]  ;;  %s1205_s16 = smov 96   ;;  %s846_s26 = sshll.u32 %s1265_s28, 3  ;;  %vm629_vm7 = vcmask 326656  }
  0x48   : > { %v344_v7 = vpack.c.bf16 %v341_v5, %v341_v5  ;;  %v854_v10 = vld [vmem:[#allocation12 + $0x18] sm:$0xff]  ;;  %v853_v11 = vld [vmem:[#allocation12 + $0x10] sm:$0xff]  ;;  %v959_v18 = vld [vmem:[%s1436_s5] ss:$0 sm:$0xff]  ;;  %s645_s30 = scalar_lea.hbm %s1437_s6, %s846_s26  ;;  %s647_s7 = sshll.u32 %s1375_s1, 4  ;;  %vm631_vm8 = vcmask 588800   ;;  %s648_s7 = int_to_ptr.vmem [resolvable:$true] %s647_s7 }
  0x49   : > { %v862_v14 = vld [vmem:[#allocation10 + $0x28] sm:$0xff]  ;;  %v861_v15 = vld [vmem:[#allocation10 + $0x20] sm:$0xff]  ;;  %v860_v24 = vld [vmem:[#allocation10 + $0x18] sm:$0xff]  ;;  %s649_s8 = sshll.u32 %s645_s30, 4  ;;  %s635_s28 = scalar_lea.sflag [#allocation6], %s1359_s14  ;;  %s650_s8 = int_to_ptr.hbm [resolvable:$true] %s649_s8 }
  0x4a   : > { %374 = vmatpush.bf16.msra.mxu0 %v849_v4  ;;  %493 = vmatpush.bf16.msra.mxu2 %v862_v14  ;;  %v342_v16 = vld [vmem:[#allocation2] sm:$0xff]  ;;  %v864_v62 = vld [vmem:[#allocation12 + $0x48] sm:$0xff]  ;;  %s1133_s10 = sshra.s32 %s650_s8, 4  ;;  %s1134_s10 = int_to_ptr.hbm [resolvable:$true] %s1133_s10 }
  0x4b   : > { %449 = vmatpush.bf16.msra.mxu1 %v857_v6  ;;  %v467_v17 = vpack.c.bf16 %v342_v16, %v342_v16  ;;  %521 = vmatpush.bf16.msra.mxu3 %v860_v24  ;;  %v859_v25 = vld [vmem:[#allocation10 + $0x10] sm:$0xff]  ;;  %v343_v54 = vld [vmem:[#allocation3] sm:$0xff]  ;;  %p1140_p7 = scmp.lt.s32.totalorder %s1134_s10, %s1437_s6 }
  0x4c   : > { %v960_v28 = vld [vmem:[%s1436_s5 + $0x2] ss:$0 sm:$0xff]  ;;  %v961_v34 = vld [vmem:[%s1436_s5 + $0x1] ss:$0 sm:$0xff] }
  0x4d   : > { %783 = vmatmul.msk.bf16.vlgmr.msra.gmra.mxu0 %vm363_vm1, %v344_v7  ;;  %v863_v63 = vld [vmem:[#allocation12 + $0x40] sm:$0xff] }
  0x4e   : > { %494 = vmatpush.bf16.msra.mxu2 %v861_v15  ;;  %604 = vmatpush.bf16.msrb.mxu0 %v864_v62  ;;  %v962_v7 = vld [vmem:[%s1436_s5 + $0x3] ss:$0 sm:$0xff] }
  0x4f   : > { %450 = vmatpush.bf16.msra.mxu1 %v856_v8  ;;  %522 = vmatpush.bf16.msra.mxu3 %v859_v25 }
  0x51   : > { %824 = vmatmul.msk.bf16.vlgmr.msra.gmra.mxu2 %vm363_vm1, %v467_v17 }
  0x52   : > { %605 = vmatpush.bf16.msrb.mxu0 %v863_v63 }
  0x53   : > { %451 = vmatpush.bf16.msra.mxu1 %v855_v9 }
  0x57   : > { %452 = vmatpush.bf16.msra.mxu1 %v854_v10 }
  0x5b   : > { %453 = vmatpush.bf16.msra.mxu1 %v853_v11 }
  0x5f   : > { %454 = vmatpush.bf16.msra.mxu1 %v852_v12 }
  0x63   : > { %455 = vmatpush.bf16.msra.mxu1 %v851_v13 }
  0xca   : > { %v376_v19 = vpop.f32.mrf.mxu0 }
  0xcb   : > { %v377_v20 = vadd.f32 %v959_v18, %v376_v19 }
  0xcd   : > { %v380_v21 = vmax.f32 %v377_v20, 0.0 }
  0xcf   : > { %v381_v22 = vpack.c.bf16 %v380_v21, %v380_v21 }
  0xd1   : > { %456 = vmatmul.bf16.vlgmr.msra.gmra.mxu1 %v381_v22 }
  0xd2   : > { %v378_v23 = vpop.f32.mrf.mxu0 }
  0xd4   : > { %v496_v26 = vpop.f32.mrf.mxu2 }
  0xdc   : > { %v498_v27 = vpop.f32.mrf.mxu2 }
 0x14e   : > { %v457_v29 = vpop.f32.mrf.mxu1 }
 0x14f   : > { %v458_v30 = vadd.f32 %v960_v28, %v457_v29 }
 0x151   : > { %v461_v31 = vmax.f32 %v458_v30, 0.0 }
 0x153   : > { %v462_v32 = vpack.c.bf16 %v461_v31, %v461_v31 }
 0x155   : > { %833 = vmatmul.msk.bf16.vlgmr.msra.gmra.mxu3 %vm363_vm1, %v462_v32 }
 0x156   : > { %v459_v33 = vpop.f32.mrf.mxu1 }
 0x1d8   : > { %v524_v35 = vpop.f32.mrf.mxu3 }
 0x1d9   : > { %v525_v36 = vadd.f32 %v524_v35, %v496_v26 }
 0x1db   : > { %v530_v37 = vadd.f32 %v961_v34, %v525_v36 }
 0x1dd   : > { %v834_v38 = vmul.f32 -1.442695, %v530_v37 }
 0x1df   : > { %963 = vpow2.f32 %v834_v38 }
 0x1e0   : > { %v526_v39 = vpop.f32.mrf.mxu3 }
 0x1e5   : > { %v964_v40 = vpop.eup %963 }
 0x1e6   : > { %v534_v41 = vadd.f32 1.0, %v964_v40 }
 0x1e8   : > { %965 = vrcp.f32 %v534_v41  ;;  %v546_v45 = vand.u32 2147483648, %v534_v41  ;;  %v544_v47 = vand.u32 2147483647, %v534_v41  ;;  %vm540_vm3 = vweird.f32 %v534_v41 }
 0x1ea   : > { %v547_v49 = vor.u32 1.1754944e-38, %v546_v45  ;;  %vm545_vm5 = vcmp.eq.f32.partialorder %v544_v47, 8.507059e+37 }
 0x1ee   : > { %v966_v42 = vpop.eup %965 }
 0x1ef   : > { %v536_v43 = vmul.f32 %v966_v42, %v534_v41  ;;  %vm541_vm2 = vweird.f32 %v966_v42 }
 0x1f0   : > { %vm542_vm4 = vmor %vm540_vm3, %vm541_vm2 }
 0x1f1   : > { %v537_v44 = vsub.f32 1.0, %v536_v43 }
 0x1f3   : > { %v538_v46 = vmul.f32 %v966_v42, %v537_v44 }
 0x1f5   : > { %v539_v48 = vadd.f32 %v966_v42, %v538_v46 }
 0x1f7   : > { %v543_v50 = vsel %vm542_vm4, %v966_v42, %v539_v48 }
 0x1f8   : > { %v548_v51 = vsel %vm545_vm5, %v547_v49, %v543_v50 }
 0x1f9   : > { %v550_v52 = vmul.f32 2.0, %v548_v51 }
 0x1fb   : > { %v835_v53 = vadd.f32 -1.0, %v550_v52 }
 0x1fd   : > { %558 = vrot.lane.b32.xlu0 %v835_v53, %s1201_s12 }
 0x205   : > { %553 = vrot.lane.b32.xlu0 %v343_v54, %s1202_s19 }
 0x26f   : > { %v559_v55 = vpop.permute.xlu0 %558 }
 0x270   : > { %v561_v56 = vmul.f32 %v559_v55, %v548_v51 }
 0x272   : > { %563 = vrot.lane.b32.xlu1 %v561_v56, %s1202_s19 }
 0x277   : > { %v554_v57 = vpop.permute.xlu0 %553 }
 0x278   : > { %v556_v58 = vmul.f32 %v554_v57, %v548_v51 }
 0x2e4   : > { %v564_v59 = vpop.permute.xlu1 %563 }
 0x2e5   : > { %v566_v60 = vadd.f32 %v564_v59, %v556_v58 }
 0x2e7   : > { %967 = vtanh.f32 %v566_v60  ;;  %624 = vrot.lane.b32.xlu0 %v566_v60, %s1203_s20 }
 0x2ed   : > { %v968_v61 = vpop.eup %967 }
 0x2ee   : > { %569 = vrot.lane.b32.xlu1 %v968_v61, %s1201_s12  ;;  %s1135_s12 = scalar_lea.hbm %s1134_s10, 8 }
 0x2ef   : > { %p1136_p1 = scmp.ne.s32.totalorder %s1134_s10, %s1135_s12 }
 0x2f1   : > { %p1137_p4 = pnand %p1136_p1, %p1328_p5 }
 0x2f3   : > { %p1138_p12 = pneg %p1137_p4 }
 0x359   : > { %v625_v10 = vpop.permute.xlu0 %624 }
 0x360   : > { %v570_v0 = vpop.permute.xlu1 %569 }
 0x361   : > { %v572_v1 = vmul.f32 %v570_v0, %v548_v51 }
 0x363   : > { %612 = vrot.lane.b32.xlu1 %v572_v1, %s1202_s19  ;;  %v573_v2 = vpack.c.bf16 %v572_v1, %v572_v1 }
 0x365   : > { %581 = vrot.lane.b32.xlu2 %v573_v2, %s1202_s19 }
 0x36d   : > { %621 = vrot.lane.b32.xlu2 %v572_v1, %s1204_s25  ;;  %s1139_s25 = scalar_lea.hbm %s1437_s6, 48 }
 0x36e   : > { %p1141_p8 = scmp.lt.s32.totalorder %s1139_s25, %s1135_s12 }
 0x370   : > { %p1142_p9 = por %p1141_p8, %p1140_p7 }
 0x372   : > { %p1143_p10 = pnand %p1142_p9, %p1138_p12 }
 0x375   : > { %617 = vrot.lane.b32.xlu2 %v566_v60, %s1205_s16 }
 0x3bf   : > { %v582_v3 = vpop.permute.xlu2 %581 }
 0x3c0   : > { %844 = vmatmul.msk.bf16.vlgmr.msrb.gmra.mxu0 %vm363_vm1, %v582_v3 }
 0x3c7   : > { %v622_v4 = vpop.permute.xlu2 %621 }
 0x3cf   : > { %v618_v5 = vpop.permute.xlu2 %617 }
 0x3d0   : > { %620 = vst.msk [vmem:[#allocation3] sm:$0xff] %vm363_vm1, %v618_v5 }
 0x3d5   : > { %v613_v6 = vpop.permute.xlu1 %612 }
 0x3d6   : > { %615 = vst.msk [vmem:[#allocation2] sm:$0xff] %vm363_vm1, %v613_v6 }
 0x43d   : > { %v607_v8 = vpop.f32.mrf.mxu0 }
 0x43e   : > { %v608_v9 = vadd.f32 %v962_v7, %v607_v8 }
 0x440   : > { %v628_v11 = vsel %vm627_vm6, %v608_v9, %v622_v4 }
 0x441   : > { %v630_v12 = vsel %vm629_vm7, %v628_v11, %v625_v10 }
 0x442   : > { %v632_v13 = vsel %vm631_vm8, %v630_v12, 0.0 }
 0x443   : > { %633 = vst [vmem:[%s1375_s1] sm:$0xff] %v632_v13 }
 0x444   : > { %1146 = shalt.err (!%p1143_p10)
}
 0x445   : > { %883 = dma.vmem_to_hbm [thread:$0]  (%p1328_p5), %s648_s7, 128, %s650_s8, %s635_s28   ;;  %v609_v14 = vpop.f32.mrf.mxu0 }
 0x446 PF: > { %p915_p13 = scmp.ge.s32.totalorder %s1193_s24, 2  ;;  %s661_s14 = sand.u32 1, %s1181_s21  }
 0x447   : > { %s662_s1 = scalar_lea.sflag [#allocation6], %s661_s14 }
 0x448   : > { %p903_p11 = pnand %p915_p13, %p1332_p6 }
 0x44a   : > { %p904_p0 = pneg %p903_p11 }
 0x44c   : > { %1176 = dma.done.wait (%p904_p0), %s662_s1, 128  }
 0x44d   : > { %1178 = vsyncadd (%p904_p0), %s662_s1, 4294967168  ;;  %p21_p2 = scmp.ge.s32.totalorder %s1302_s9, 8   ;;  %s1448_s21 = smov %s1185_s22 }
 0x44e   : > { %s1449_s22 = smov %s1189_s23  ;;  %s1450_s23 = smov %s1313_s13 }
 0x44f   : > { %s1451_s24 = smov %s1302_s9  ;;  %23 = sbr.rel (!%p21_p2) target bundleno = 9 (0x9), region = 109 }
 0x454   :  { %668 = vsyncpa [#allocation5], 1 }
 0x455   :  { %670 = vsyncpa [#allocation5 + $0x1], 1 }
 0x456   :  { %671 = vsyncpa [#allocation8], 1 }
 0x457   :  { %672 = vsyncpa [#allocation11], 1 }
 0x458   :  { %673 = vsyncpa [#allocation6], 1 }
 0x459   :  { %675 = vsyncpa [#allocation6 + $0x1], 1 }

</bundles_post_ra>
